<compile_context>
chip_gen: v6e
topology: v6e:2x2x1
jax: 0.10.0
libtpu: 0.0.40
codegen_flags: <defaults>
</compile_context>

<pallas_src>
import jax
import jax.numpy as jnp
from jax.experimental import pallas as pl
from jax.experimental.pallas import tpu as pltpu


def _round_up(x, m):
    return ((x + m - 1) // m) * m


def _cdiv(a, b):
    return -(-a // b)


def readout_kernel(len_ref, x_ref, w_cat_ref, b_cat_ref, w_mlp_ref, b_mlp_ref, out_ref):
    bb = len_ref.shape[0]                 # batches in this tile (multiple of 8)
    n = x_ref.shape[0] // bb              # padded nodes per graph (multiple of sublane tile)
    De = w_mlp_ref.shape[0]               # round_up(D, 128) embedding lanes

    # ---- fused emb + att matmul: one (bb*n, D) @ (D, De+128) MXU pass, f32 accum ----
    h = jnp.dot(x_ref[...], w_cat_ref[...], preferred_element_type=jnp.float32)
    h = h + b_cat_ref[...]

    att = jax.nn.sigmoid(h[:, De:De + 1])          # (bb*n, 1) attention logit column
    emb = jnp.maximum(h[:, :De], 0.0)              # ReLU; 128-aligned lane slice (view)

    # (bb*n, *) -> (bb, n, *): n is a multiple of the sublane tile, so these are views.
    emb3 = emb.reshape(bb, n, De)
    att3 = att.reshape(bb, n, 1)

    # ---- narrow validity mask: single (bb, n, 1) compare against per-graph lengths ----
    len_i = len_ref[...]                                            # (bb, 1) int32, > 0
    node = jax.lax.broadcasted_iota(jnp.int32, (bb, n, 1), 1)
    valid3 = node < len_i.reshape(bb, 1, 1)                         # (bb, n, 1) bool

    # Fuse mask and attention before touching the wide tensor.
    scale3 = jnp.where(valid3, att3, 0.0)                           # narrow (bb, n, 1)
    g3 = scale3 * emb3                                              # ONE wide VPU multiply

    # ---- masked mean + max pooling over nodes ----
    inv_n = 1.0 / len_i.astype(jnp.float32)                         # exact, tiny (bb, 1)
    mean_pool = jnp.sum(g3, axis=1) * inv_n                         # (bb, De)
    max_pool = jnp.max(jnp.where(valid3, g3, -1e9), axis=1)         # ONE wide select
    g_pool = mean_pool + max_pool                                   # (bb, De)

    # ---- final readout matmul; lane-dense (bb, Op) store ----
    out = jnp.dot(g_pool.astype(w_mlp_ref.dtype), w_mlp_ref[...],
                  preferred_element_type=jnp.float32) + b_mlp_ref[...]
    out_ref[...] = out.astype(out_ref.dtype)


def prepare_kernel_params(params, input_dim, output_dim, matmul_dtype=jnp.float32):
    """Pack PyTorch-convention Linear weights into fused, 128-lane-padded layouts.

    Layout: lanes [0, D) of w_cat are the emb weights, lane De (= round_up(D,128)) is
    the attention logit; w_mlp has K = De rows so the attention block never enters the
    second matmul. Pad rows/cols are zero (mathematically inert).
    """
    D, O = input_dim, output_dim
    De = _round_up(D, 128)
    Dcat = De + 128
    Op = _round_up(O, 128)

    w_cat = jnp.zeros((D, Dcat), jnp.float32)
    w_cat = w_cat.at[:, :D].set(params['emb_w'].T)
    w_cat = w_cat.at[:, De].set(params['att_w'][0])
    b_cat = jnp.zeros((1, Dcat), jnp.float32)
    b_cat = b_cat.at[0, :D].set(params['emb_b'])
    b_cat = b_cat.at[0, De].set(params['att_b'][0])

    w_mlp = jnp.zeros((De, Op), jnp.float32).at[:D, :O].set(params['mlp_w'].T)
    b_mlp = jnp.zeros((1, Op), jnp.float32).at[0, :O].set(params['mlp_b'])
    return dict(w_cat=w_cat.astype(matmul_dtype), b_cat=b_cat,
                w_mlp=w_mlp.astype(matmul_dtype), b_mlp=b_mlp)


def readout_layer(x, lengths, kparams, *, output_dim,
                  compute_dtype=jnp.float32, block_b=None):
    """x: (B, N, D) node features; lengths: (B,) valid-node counts (>= 1 per graph)."""
    B, N, D = x.shape
    De, Op = kparams['w_mlp'].shape
    Dcat = kparams['w_cat'].shape[1]

    itemsize = jnp.dtype(compute_dtype).itemsize
    sub = 16 if itemsize == 2 else 8
    N_pad = _round_up(N, sub)           # keep the in-kernel reshape a view

    if block_b is None:
        # Largest multiple-of-8 batch tile whose double-buffered x slab + wide
        # intermediates stay well under the vmem limit (headroom for v7x's 64 MiB VMEM),
        # then re-balanced so batch padding stays small.
        per_batch = 2 * N_pad * D * itemsize + 4 * N_pad * De * 4
        cap = max(8, min(_round_up(B, 8), (8 << 20) // max(per_batch, 1)))
        cap = max(8, (cap // 8) * 8)
        num_tiles = _cdiv(_round_up(B, 8), cap)
        block_b = _round_up(_cdiv(_round_up(B, 8), num_tiles), 8)
    block_b = max(8, _round_up(block_b, 8))
    B_pad = _round_up(B, block_b)

    # Wrapper-side padding: pad graphs get length 1 and zero features (outputs sliced off);
    # pad nodes are masked out in-kernel (iota >= length).
    x_p = jnp.zeros((B_pad, N_pad, D), compute_dtype).at[:B, :N].set(x.astype(compute_dtype))
    len_p = jnp.ones((B_pad, 1), jnp.int32).at[:B, 0].set(lengths.astype(jnp.int32))
    x2 = x_p.reshape(B_pad * N_pad, D)

    grid = (B_pad // block_b,)
    out_p = pl.pallas_call(
        readout_kernel,
        out_shape=jax.ShapeDtypeStruct((B_pad, Op), jnp.float32),
        grid=grid,
        in_specs=[
            pl.BlockSpec((block_b, 1), lambda i: (i, 0)),            # lengths
            pl.BlockSpec((block_b * N_pad, D), lambda i: (i, 0)),    # x rows for this tile
            pl.BlockSpec((D, Dcat), lambda i: (0, 0)),               # fused emb+att weight (resident)
            pl.BlockSpec((1, Dcat), lambda i: (0, 0)),
            pl.BlockSpec((De, Op), lambda i: (0, 0)),                # readout weight (resident)
            pl.BlockSpec((1, Op), lambda i: (0, 0)),
        ],
        out_specs=pl.BlockSpec((block_b, Op), lambda i: (i, 0)),
        compiler_params=pltpu.CompilerParams(
            dimension_semantics=("parallel",),
            vmem_limit_bytes=64 * 1024 * 1024,
        ),
    )(len_p, x2, kparams['w_cat'], kparams['b_cat'], kparams['w_mlp'], kparams['b_mlp'])
    return out_p[:B, :output_dim]


# -------------- init + pure-JAX reference (PyTorch-convention params) --------------

def xavier_uniform(key, shape):
    fan_out, fan_in = shape
    bound = (6.0 / (fan_in + fan_out)) ** 0.5
    return jax.random.uniform(key, shape, jnp.float32, -bound, bound)


def init_params(key, input_dim, output_dim):
    ks = jax.random.split(key, 6)
    return dict(
        att_w=xavier_uniform(ks[0], (1, input_dim)),
        att_b=jax.random.uniform(ks[3], (1,), jnp.float32, -0.1, 0.1),
        emb_w=xavier_uniform(ks[1], (input_dim, input_dim)),
        emb_b=jax.random.uniform(ks[4], (input_dim,), jnp.float32, -0.1, 0.1),
        mlp_w=xavier_uniform(ks[2], (output_dim, input_dim)),
        mlp_b=jax.random.uniform(ks[5], (output_dim,), jnp.float32, -0.1, 0.1),
    )


def readout_reference(x, mask, p):
    att = jax.nn.sigmoid(jnp.einsum('bnd,od->bno', x, p['att_w']) + p['att_b'])
    emb = jax.nn.relu(jnp.einsum('bnd,ed->bne', x, p['emb_w']) + p['emb_b'])
    n = jnp.sum(mask, axis=1)
    m = (mask - 1.0) * 1e9
    g = mask * att * emb
    g = jnp.sum(g, axis=1) / n + jnp.max(g + m, axis=1)
    return g @ p['mlp_w'].T + p['mlp_b']


if __name__ == "__main__":
    B, N, D, O = 2, 8, 32, 16
    key = jax.random.PRNGKey(0)
    k_x, k_p = jax.random.split(key)

    x = jax.random.normal(k_x, (B, N, D), jnp.float32)
    lengths = jnp.array([8, 5], dtype=jnp.int32)        # per-graph valid node counts
    mask = (jnp.arange(N)[None, :] < lengths[:, None]).astype(jnp.float32)[:, :, None]

    params = init_params(k_p, D, O)
    kparams = prepare_kernel_params(params, D, O)       # f32 matmul inputs for the test

    out = readout_layer(x, lengths, kparams, output_dim=O)
    out = jax.block_until_ready(out)

    ref = readout_reference(x, mask, params)
    assert out.shape == (B, O)
    err = jnp.max(jnp.abs(out - ref))
    assert jnp.allclose(out, ref, atol=1e-4, rtol=1e-4), f"mismatch vs reference: {err}"
    print("KERNEL_OK")
</pallas_src>

<mosaic_0001>
module attributes {stable_mosaic.version = 11 : i64} {
  func.func @readout_kernel(%arg0: i32, %arg1: memref<8x1xi32, #tpu.memory_space<vmem>>, %arg2: memref<64x32xf32, #tpu.memory_space<vmem>>, %arg3: memref<32x256xf32, #tpu.memory_space<vmem>>, %arg4: memref<1x256xf32, #tpu.memory_space<vmem>>, %arg5: memref<128x128xf32, #tpu.memory_space<vmem>>, %arg6: memref<1x128xf32, #tpu.memory_space<vmem>>, %arg7: memref<8x128xf32, #tpu.memory_space<vmem>>) attributes {dimension_semantics = [#tpu.dimension_semantics<parallel>], iteration_bounds = array<i64: 1>, scalar_prefetch = 0 : i64, scratch_operands = 0 : i64, tpu.core_type = #tpu.core_type<tc>, window_params = [{transform_indices = @transform_0, window_bounds = array<i64: 8, 1>}, {transform_indices = @transform_1, window_bounds = array<i64: 64, 32>}, {pipeline_mode = #tpu.pipeline_mode<synchronous>, transform_indices = @transform_2, window_bounds = array<i64: 32, 256>}, {pipeline_mode = #tpu.pipeline_mode<synchronous>, transform_indices = @transform_3, window_bounds = array<i64: 1, 256>}, {pipeline_mode = #tpu.pipeline_mode<synchronous>, transform_indices = @transform_4, window_bounds = array<i64: 128, 128>}, {pipeline_mode = #tpu.pipeline_mode<synchronous>, transform_indices = @transform_5, window_bounds = array<i64: 1, 128>}, {transform_indices = @transform_6, window_bounds = array<i64: 8, 128>}]} {
    %c0 = arith.constant 0 : index
    %c0_0 = arith.constant 0 : index
    %0 = vector.load %arg2[%c0, %c0_0] : memref<64x32xf32, #tpu.memory_space<vmem>>, vector<64x32xf32>
    %c0_1 = arith.constant 0 : index
    %c0_2 = arith.constant 0 : index
    %1 = vector.load %arg3[%c0_1, %c0_2] : memref<32x256xf32, #tpu.memory_space<vmem>>, vector<32x256xf32>
    %cst = arith.constant dense<0.000000e+00> : vector<64x256xf32>
    %2 = tpu.matmul %0, %1, %cst {dimension_numbers = #tpu.dot_dimension_numbers<[1], [0], [0], [1], [0, 0, 1, 1], [], []>} : vector<64x32xf32>, vector<32x256xf32>, vector<64x256xf32> -> vector<64x256xf32>
    %c0_3 = arith.constant 0 : index
    %c0_4 = arith.constant 0 : index
    %3 = vector.load %arg4[%c0_3, %c0_4] : memref<1x256xf32, #tpu.memory_space<vmem>>, vector<1x256xf32>
    %4 = vector.broadcast %3 : vector<1x256xf32> to vector<64x256xf32>
    %5 = arith.addf %2, %4 : vector<64x256xf32>
    %6 = vector.extract_strided_slice %5 {offsets = [0, 128], sizes = [64, 1], strides = [1, 1]} : vector<64x256xf32> to vector<64x1xf32>
    %7 = arith.negf %6 : vector<64x1xf32>
    %8 = math.exp %7 : vector<64x1xf32>
    %cst_5 = arith.constant 1.000000e+00 : f32
    %9 = vector.broadcast %cst_5 : f32 to vector<64x1xf32>
    %10 = arith.addf %9, %8 : vector<64x1xf32>
    %11 = arith.divf %9, %10 : vector<64x1xf32>
    %12 = vector.extract_strided_slice %5 {offsets = [0, 0], sizes = [64, 128], strides = [1, 1]} : vector<64x256xf32> to vector<64x128xf32>
    %cst_6 = arith.constant 0.000000e+00 : f32
    %13 = vector.broadcast %cst_6 : f32 to vector<64x128xf32>
    %14 = arith.maximumf %12, %13 : vector<64x128xf32>
    %15 = vector.shape_cast %14 : vector<64x128xf32> to vector<8x8x128xf32>
    %16 = vector.shape_cast %11 : vector<64x1xf32> to vector<8x8x1xf32>
    %c0_7 = arith.constant 0 : index
    %c0_8 = arith.constant 0 : index
    %17 = vector.load %arg1[%c0_7, %c0_8] : memref<8x1xi32, #tpu.memory_space<vmem>>, vector<8x1xi32>
    %18 = tpu.iota {dimensions = array<i32: 1>} : vector<8x8x1xi32>
    %19 = vector.shape_cast %17 : vector<8x1xi32> to vector<8x1x1xi32>
    %20 = vector.broadcast %19 : vector<8x1x1xi32> to vector<8x8x1xi32>
    %21 = arith.cmpi slt, %18, %20 : vector<8x8x1xi32>
    %cst_9 = arith.constant 0.000000e+00 : f32
    %22 = vector.broadcast %cst_9 : f32 to vector<8x8x1xf32>
    %23 = arith.select %21, %16, %22 : vector<8x8x1xi1>, vector<8x8x1xf32>
    %24 = vector.broadcast %23 : vector<8x8x1xf32> to vector<8x8x128xf32>
    %25 = arith.mulf %24, %15 : vector<8x8x128xf32>
    %26 = arith.sitofp %17 : vector<8x1xi32> to vector<8x1xf32>
    %cst_10 = arith.constant 1.000000e+00 : f32
    %27 = vector.broadcast %cst_10 : f32 to vector<8x1xf32>
    %28 = arith.divf %27, %26 : vector<8x1xf32>
    %cst_11 = arith.constant dense<0.000000e+00> : vector<8x128xf32>
    %29 = vector.multi_reduction <add>, %25, %cst_11 [1] : vector<8x8x128xf32> to vector<8x128xf32>
    %30 = vector.broadcast %28 : vector<8x1xf32> to vector<8x128xf32>
    %31 = arith.mulf %29, %30 : vector<8x128xf32>
    %cst_12 = arith.constant -1.000000e+09 : f32
    %32 = vector.shape_cast %21 : vector<8x8x1xi1> to vector<8x8x1xi1>
    %33 = vector.broadcast %32 : vector<8x8x1xi1> to vector<8x8x128xi1>
    %34 = vector.broadcast %cst_12 : f32 to vector<8x8x128xf32>
    %35 = arith.select %33, %25, %34 : vector<8x8x128xi1>, vector<8x8x128xf32>
    %cst_13 = arith.constant dense<0xFF800000> : vector<8x128xf32>
    %36 = vector.multi_reduction <maximumf>, %35, %cst_13 [1] : vector<8x8x128xf32> to vector<8x128xf32>
    %37 = arith.addf %31, %36 : vector<8x128xf32>
    %c0_14 = arith.constant 0 : index
    %c0_15 = arith.constant 0 : index
    %38 = vector.load %arg5[%c0_14, %c0_15] : memref<128x128xf32, #tpu.memory_space<vmem>>, vector<128x128xf32>
    %cst_16 = arith.constant dense<0.000000e+00> : vector<8x128xf32>
    %39 = tpu.matmul %37, %38, %cst_16 {dimension_numbers = #tpu.dot_dimension_numbers<[1], [0], [0], [1], [0, 0, 1, 1], [], []>} : vector<8x128xf32>, vector<128x128xf32>, vector<8x128xf32> -> vector<8x128xf32>
    %c0_17 = arith.constant 0 : index
    %c0_18 = arith.constant 0 : index
    %40 = vector.load %arg6[%c0_17, %c0_18] : memref<1x128xf32, #tpu.memory_space<vmem>>, vector<1x128xf32>
    %41 = vector.broadcast %40 : vector<1x128xf32> to vector<8x128xf32>
    %42 = arith.addf %39, %41 : vector<8x128xf32>
    %c0_19 = arith.constant 0 : index
    %c0_20 = arith.constant 0 : index
    %43 = vector.load %arg7[%c0_19, %c0_20] : memref<8x128xf32, #tpu.memory_space<vmem>>, vector<8x128xf32>
    tpu.vector_store %arg7[%c0_19, %c0_20], %42 {strides = array<i32>} : memref<8x128xf32, #tpu.memory_space<vmem>>, vector<8x128xf32>,
    return
  }
  func.func @transform_0(%arg0: i32) -> (i32, i32) {
    %c0_i32 = arith.constant 0 : i32
    %c0_i32_0 = arith.constant 0 : i32
    return %arg0, %c0_i32 : i32, i32
  }
  func.func @transform_1(%arg0: i32) -> (i32, i32) {
    %c0_i32 = arith.constant 0 : i32
    %c0_i32_0 = arith.constant 0 : i32
    return %arg0, %c0_i32 : i32, i32
  }
  func.func @transform_2(%arg0: i32) -> (i32, i32) {
    %c0_i32 = arith.constant 0 : i32
    %c0_i32_0 = arith.constant 0 : i32
    %c0_i32_1 = arith.constant 0 : i32
    return %c0_i32, %c0_i32_0 : i32, i32
  }
  func.func @transform_3(%arg0: i32) -> (i32, i32) {
    %c0_i32 = arith.constant 0 : i32
    %c0_i32_0 = arith.constant 0 : i32
    %c0_i32_1 = arith.constant 0 : i32
    return %c0_i32, %c0_i32_0 : i32, i32
  }
  func.func @transform_4(%arg0: i32) -> (i32, i32) {
    %c0_i32 = arith.constant 0 : i32
    %c0_i32_0 = arith.constant 0 : i32
    %c0_i32_1 = arith.constant 0 : i32
    return %c0_i32, %c0_i32_0 : i32, i32
  }
  func.func @transform_5(%arg0: i32) -> (i32, i32) {
    %c0_i32 = arith.constant 0 : i32
    %c0_i32_0 = arith.constant 0 : i32
    %c0_i32_1 = arith.constant 0 : i32
    return %c0_i32, %c0_i32_0 : i32, i32
  }
  func.func @transform_6(%arg0: i32) -> (i32, i32) {
    %c0_i32 = arith.constant 0 : i32
    %c0_i32_0 = arith.constant 0 : i32
    return %arg0, %c0_i32 : i32, i32
  }
}

</mosaic_0001>

<bundles_post_ra>
// kernel: tpu_custom_call.1
= control target key start
LH: loop header
LB: loop body
LE: loop exit
PB: predicated region body
PF: predicated region fallthrough
CT: control target
= control target key end

     0   :  { %11 = vsyncpa [#allocation3], 0  ;;  %s1177_s0 = inlined_call_operand.vmem [shape: s32[8,1], index: 0, kind: input, shape index: {}]   ;;  %s1178_s1 = inlined_call_operand.vmem [shape: f32[64,32], index: 1, kind: input, shape index: {}]   ;;  %s1179_s2 = inlined_call_operand.vmem [shape: f32[32,256], index: 2, kind: input, shape index: {}]   ;;  %s1180_s3 = inlined_call_operand.vmem [shape: f32[1,256], index: 3, kind: input, shape index: {}]   ;;  %s1181_s4 = inlined_call_operand.hbm [shape: f32[128,128], index: 4, kind: input, shape index: {}]   ;;  %s1182_s5 = inlined_call_operand.vmem [shape: f32[1,128], index: 5, kind: input, shape index: {}]   ;;  %s1183_s6 = inlined_call_operand.hbm [shape: f32[8,128], index: 6, kind: output, shape index: {}]  }
   0x1   :  { %12 = vsyncpa [#allocation4], 0  ;;  %s887_s21 = smov [#allocation2]  }
   0x2   :  { %s26_s22 = sshll.u32 %s887_s21, 4  ;;  %s27_s22 = int_to_ptr.vmem [resolvable:$true] %s26_s22 }
   0x3   :  { %s851_s23 = scalar_lea.vmem %s27_s22, 2048  ;;  %p856_p1 = scmp.lt.s32.totalorder %s27_s22, %s27_s22 }
   0x4   :  { %p852_p0 = scmp.ne.s32.totalorder %s27_s22, %s851_s23  ;;  %p857_p2 = scmp.lt.s32.totalorder %s851_s23, %s851_s23 }
   0x6   :  { %p858_p3 = por %p857_p2, %p856_p1 }
   0x8   :  { %p859_p4 = pnand %p858_p3, %p852_p0 }
   0xa   :  { %862 = shalt.err (!%p859_p4)
}
   0xb   :  { %s888_s24 = smov 128   ;;  %s889_s25 = smov 8  }
   0xc   :  { %32 = dma.hbm_to_vmem [thread:$0]  %s1181_s4, 2048, %s27_s22, [#allocation3], %s888_s24, %s888_s24, %s889_s25  }
   0xd   :  { %883 = dma.done.wait [#allocation3], 2048  }
   0xe   :  { %884 = vsyncadd [#allocation3], 4294965248  ;;  %v890_v0 = vmov 0.0   ;;  %v53_v1 = vld [vmem:[%s1179_s2 + $0x38] sm:$0xff]  ;;  %v52_v2 = vld [vmem:[%s1179_s2 + $0x30] sm:$0xff]  ;;  %vm66_vm0 = vcmask 261120   ;;  %v56_v17 = vlaneseq }
   0xf   :  { %155 = vmatprep.mubr.f32.mxu0 %v890_v0  ;;  %763 = vmatprep.subr.mxu1 %v890_v0  ;;  %v51_v3 = vld [vmem:[%s1179_s2 + $0x28] sm:$0xff]  ;;  %v50_v4 = vld [vmem:[%s1179_s2 + $0x20] sm:$0xff]  ;;  %v49_v5 = vld [vmem:[%s1179_s2 + $0x18] sm:$0xff]  ;;  %v891_v18 = vmov 1966171168   ;;  %v892_v35 = vmov 0  }
  0x10   :  { %115 = vmatprep.subr.mxu0 %v53_v1  ;;  %v48_v6 = vld [vmem:[%s1179_s2 + $0x10] sm:$0xff]  ;;  %v47_v7 = vld [vmem:[%s1179_s2 + $0x8] sm:$0xff]  ;;  %v46_v8 = vld [vmem:[%s1179_s2] sm:$0xff]  ;;  %v265_v19 = vunpack.c.l.s4 %v891_v18  ;;  %v998_v20 = vshrl.u32 %v56_v17, 7  ;;  %807 = vset.pattern.permute.xlu1 %v892_v35  ;;  %vm893_vm9 = vmmov 0   ;;  %s894_s12 = smov [#allocation5]  }
  0x11   :  { %116 = vmatpush1.msra.mxu0 %v52_v2  ;;  %v38_v9 = vld [vmem:[%s1178_s1] sm:$0xff]  ;;  %v39_v10 = vld [vmem:[%s1178_s1 + $0x8] sm:$0xff]  ;;  %v40_v11 = vld [vmem:[%s1178_s1 + $0x10] sm:$0xff]  ;;  %806 = vset.pattern.permute.xlu0 %v892_v35  ;;  %s720_s13 = sshll.u32 %s894_s12, 4  ;;  %s721_s13 = int_to_ptr.vmem [resolvable:$true] %s720_s13 }
  0x12   :  { %117 = vmatprep.subr.mxu0 %v51_v3  ;;  %v41_v12 = vld [vmem:[%s1178_s1 + $0x18] sm:$0xff]  ;;  %v42_v13 = vld [vmem:[%s1178_s1 + $0x20] sm:$0xff]  ;;  %v43_v14 = vld [vmem:[%s1178_s1 + $0x28] sm:$0xff]  ;;  %v266_v21 = vunpack.c.0.s8 %v265_v19  ;;  %v1010_v27 = vsub.s32 0, %v998_v20  ;;  %v62_v59 = vsub.s32 1, %v998_v20  ;;  %795 = vmatprep.mubr.msk.f32.mxu1 %vm893_vm9, %v890_v0  ;;  %s863_s14 = scalar_lea.vmem %s721_s13, 128  ;;  %p868_p6 = scmp.lt.s32.totalorder %s721_s13, %s721_s13 }
  0x13   :  { %118 = vmatpush1.msra.mxu0 %v50_v4  ;;  %v44_v15 = vld [vmem:[%s1178_s1 + $0x30] sm:$0xff]  ;;  %v45_v16 = vld [vmem:[%s1178_s1 + $0x38] sm:$0xff]  ;;  %v1003_v22 = vld [vmem:[%s1177_s0] sm:$0xff]  ;;  %p864_p5 = scmp.ne.s32.totalorder %s721_s13, %s863_s14  ;;  %p869_p7 = scmp.lt.s32.totalorder %s863_s14, %s863_s14 }
  0x14   :  { %119 = vmatprep.subr.mxu0 %v49_v5  ;;  %v263_v23 = vcombine.high %v1003_v22, %v1003_v22  ;;  %v269_v24 = vsub.s32 %v266_v21, %v998_v20  ;;  %v1084_v60 = vld [vmem:[%s1180_s3] sm:$0x3]  ;;  %v601_v47 = vld [vmem:[#allocation2 + $0x58] sm:$0xff] }
  0x15   :  { %120 = vmatpush1.msra.mxu0 %v48_v6  ;;  %v63_v61 = vrot.slane %v1084_v60, %v62_v59  ;;  %p870_p8 = por %p869_p7, %p868_p6 }
  0x16   :  { %121 = vmatprep.subr.mxu0 %v47_v7  ;;  %v277_v25 = vrot.slane %v263_v23, %v269_v24  ;;  %v270_v26 = vrot.slane %v1003_v22, %v269_v24 }
  0x17   :  { %122 = vmatpush1.msra.mxu0 %v46_v8  ;;  %p871_p9 = pnand %p870_p8, %p864_p5 }
  0x18   :  { %729 = vmatmul.mubr.msk.f32.vlgmr.msra.gmra.mxu0 %vm66_vm0, %v38_v9  ;;  %v293_v28 = vrot.slane %v277_v25, %v269_v24  ;;  %v278_v29 = vcombine.high %v270_v26, %v270_v26  ;;  %v286_v33 = vrot.slane %v270_v26, %v269_v24  ;;  %v279_v39 = vcombine.high %v277_v25, %v277_v25 }
  0x19   :  { %161 = vmatprep.mubr.f32.mxu0 %v890_v0 }
  0x1a   :  { %v331_v30 = vrot.slane %v293_v28, %v1010_v27  ;;  %v300_v31 = vrot.slane %v278_v29, %v269_v24  ;;  %v315_v37 = vrot.slane %v286_v33, %v1010_v27  ;;  %v307_v41 = vrot.slane %v279_v39, %v269_v24 }
  0x1b   :  { %v308_v48 = vcombine.high %v286_v33, %v286_v33  ;;  %v309_v54 = vcombine.high %v293_v28, %v293_v28 }
  0x1c   :  { %730 = vmatmul.mubr.msk.f32.gmra.mxu0 %vm66_vm0, %v39_v10  ;;  %vm1014_vm1 = vcmp.lt.s32.totalorder %v998_v20, %v331_v30  ;;  %v310_v34 = vcombine.high %v300_v31, %v300_v31  ;;  %vm1025_vm2 = vcmp.lt.s32.totalorder %v998_v20, %v315_v37  ;;  %v319_v44 = vrot.slane %v300_v31, %v1010_v27 }
  0x1d   :  { %167 = vmatprep.mubr.f32.mxu0 %v890_v0  ;;  %v490_v36 = vsel %vm1014_vm1, 1, %v892_v35  ;;  %v486_v42 = vsel %vm1025_vm2, 1, %v892_v35  ;;  %v335_v45 = vrot.slane %v307_v41, %v1010_v27  ;;  %v1053_v51 = vrot.slane %v308_v48, %v1010_v27 }
  0x1e   :  { %507 = vperm.xlu1 %807, %v490_v36   ;;  %v1022_v38 = vrot.slane %v310_v34, %v1010_v27  ;;  %495 = vperm.xlu0 %806, %v486_v42   ;;  %vm1039_vm4 = vcmp.lt.s32.totalorder %v998_v20, %v319_v44  ;;  %v311_v53 = vcombine.high %v307_v41, %v307_v41 }
  0x1f   :  { %vm1044_vm5 = vcmp.lt.s32.totalorder %v998_v20, %v335_v45  ;;  %v487_v49 = vsel %vm1039_vm4, 1, %v892_v35  ;;  %vm346_vm6 = vcmp.lt.s32.totalorder %v998_v20, %v1053_v51  ;;  %v1066_v56 = vrot.slane %v309_v54, %v1010_v27  ;;  %v605_v51 = vld [vmem:[#allocation2 + $0x78] sm:$0xff] }
  0x20   :  { %731 = vmatmul.mubr.msk.f32.gmra.mxu0 %vm66_vm0, %v40_v11  ;;  %vm347_vm3 = vcmp.lt.s32.totalorder %v998_v20, %v1022_v38  ;;  %v491_v50 = vsel %vm1044_vm5, 1, %v892_v35  ;;  %v488_v52 = vsel %vm346_vm6, 1, %v892_v35  ;;  %v1061_v55 = vrot.slane %v311_v53, %v1010_v27  ;;  %764 = vmatpush3.msra.mxu1 %v605_v51 }
  0x21   :  { %173 = vmatprep.mubr.f32.mxu0 %v890_v0  ;;  %v489_v43 = vsel %vm347_vm3, 1, %v892_v35  ;;  %vm350_vm8 = vcmp.lt.s32.totalorder %v998_v20, %v1066_v56  ;;  %765 = vmatprep.subr.mxu1 %v890_v0  ;;  %v599_v56 = vld [vmem:[#allocation2 + $0x48] sm:$0xff] }
  0x22   :  { %504 = vperm.xlu1 %807, %v489_v43   ;;  %498 = vperm.xlu0 %806, %v487_v49   ;;  %vm351_vm7 = vcmp.lt.s32.totalorder %v998_v20, %v1061_v55  ;;  %v1078_v58 = vsel %vm350_vm8, 1, %v892_v35  ;;  %v597_v20 = vld [vmem:[#allocation2 + $0x38] sm:$0xff]  ;;  %v596_v55 = vld [vmem:[#allocation2 + $0x30] sm:$0xff] }
  0x23   :  { %v1071_v57 = vsel %vm351_vm7, 1, %v892_v35 }
  0x24   :  { %732 = vmatmul.mubr.msk.f32.gmra.mxu0 %vm66_vm0, %v41_v12 }
  0x25   :  { %179 = vmatprep.mubr.f32.mxu0 %v890_v0 }
  0x26   :  { %510 = vperm.xlu1 %807, %v491_v50   ;;  %501 = vperm.xlu0 %806, %v488_v52  }
  0x28   :  { %733 = vmatmul.mubr.msk.f32.gmra.mxu0 %vm66_vm0, %v42_v13 }
  0x29   :  { %185 = vmatprep.mubr.f32.mxu0 %v890_v0 }
  0x2c   :  { %734 = vmatmul.mubr.msk.f32.gmra.mxu0 %vm66_vm0, %v43_v14 }
  0x2d   :  { %191 = vmatprep.mubr.f32.mxu0 %v890_v0 }
  0x30   :  { %735 = vmatmul.mubr.msk.f32.gmra.mxu0 %vm66_vm0, %v44_v15 }
  0x31   :  { %197 = vmatprep.mubr.f32.mxu0 %v890_v0 }
  0x34   :  { %736 = vmatmul.mubr.msk.f32.gmra.mxu0 %vm66_vm0, %v45_v16 }
  0xd8   :  { %v1087_v62 = vpop.f32.mrf.mxu0 }
  0xda   :  { %v159_v63 = vpop.f32.mrf.mxu0 }
  0xdb   :  { %v160_v1 = vadd.f32 %v159_v63, %v63_v61 }
  0xdc   :  { %v1089_v2 = vpop.f32.mrf.mxu0 }
  0xdd   :  { %v737_v3 = vmul.f32 -1.442695, %v160_v1 }
  0xde   :  { %v165_v4 = vpop.f32.mrf.mxu0 }
  0xdf   :  { %809 = vpow2.f32 %v737_v3  ;;  %v166_v5 = vadd.f32 %v165_v4, %v63_v61 }
  0xe0   :  { %v1091_v6 = vpop.f32.mrf.mxu0 }
  0xe1   :  { %v738_v7 = vmul.f32 -1.442695, %v166_v5 }
  0xe2   :  { %v171_v8 = vpop.f32.mrf.mxu0 }
  0xe3   :  { %811 = vpow2.f32 %v738_v7  ;;  %v172_v9 = vadd.f32 %v171_v8, %v63_v61 }
  0xe4   :  { %v1093_v10 = vpop.f32.mrf.mxu0 }
  0xe5   :  { %v739_v11 = vmul.f32 -1.442695, %v172_v9  ;;  %v408_v9 = vcvt.s32.f32 %v1003_v22 }
  0xe6   :  { %v177_v12 = vpop.f32.mrf.mxu0 }
  0xe7   :  { %813 = vpow2.f32 %v739_v11  ;;  %v178_v13 = vadd.f32 %v177_v12, %v63_v61  ;;  %v604_v12 = vld [vmem:[#allocation2 + $0x70] sm:$0xff] }
  0xe8   :  { %v1095_v14 = vpop.f32.mrf.mxu0  ;;  %766 = vmatpush3.msra.mxu1 %v604_v12 }
  0xe9   :  { %v740_v15 = vmul.f32 -1.442695, %v178_v13  ;;  %767 = vmatprep.subr.mxu1 %v890_v0  ;;  %v603_v13 = vld [vmem:[#allocation2 + $0x68] sm:$0xff] }
  0xea   :  { %v183_v16 = vpop.f32.mrf.mxu0  ;;  %768 = vmatpush3.msra.mxu1 %v603_v13 }
  0xeb   :  { %815 = vpow2.f32 %v740_v15  ;;  %v184_v17 = vadd.f32 %v183_v16, %v63_v61  ;;  %769 = vmatprep.subr.mxu1 %v890_v0  ;;  %v602_v15 = vld [vmem:[#allocation2 + $0x60] sm:$0xff] }
  0xec   :  { %v810_v18 = vpop.eup %809  ;;  %v1097_v19 = vpop.f32.mrf.mxu0  ;;  %770 = vmatpush3.msra.mxu1 %v602_v15 }
  0xed   :  { %v228_v21 = vadd.f32 1.0, %v810_v18  ;;  %v741_v23 = vmul.f32 -1.442695, %v184_v17  ;;  %771 = vmatprep.subr.mxu1 %v890_v0  ;;  %v600_v18 = vld [vmem:[#allocation2 + $0x50] sm:$0xff] }
  0xee   :  { %v189_v24 = vpop.f32.mrf.mxu0  ;;  %772 = vmatpush3.msra.mxu1 %v601_v47 }
  0xef   :  { %817 = vrcp.f32 %v228_v21  ;;  %v190_v25 = vadd.f32 %v189_v24, %v63_v61  ;;  %773 = vmatprep.subr.mxu1 %v890_v0  ;;  %v593_v24 = vld [vmem:[#allocation2 + $0x18] sm:$0xff] }
  0xf0   :  { %v812_v26 = vpop.eup %811  ;;  %819 = vpow2.f32 %v741_v23  ;;  %v1099_v28 = vpop.f32.mrf.mxu0  ;;  %774 = vmatpush3.msra.mxu1 %v600_v18  ;;  %v595_v23 = vld [vmem:[#allocation2 + $0x28] sm:$0xff] }
  0xf1   :  { %v229_v29 = vadd.f32 1.0, %v812_v26  ;;  %v742_v30 = vmul.f32 -1.442695, %v190_v25  ;;  %775 = vmatprep.subr.mxu1 %v890_v0  ;;  %v592_v25 = vld [vmem:[#allocation2 + $0x10] sm:$0xff]  ;;  %v591_v26 = vld [vmem:[#allocation2 + $0x8] sm:$0xff] }
  0xf2   :  { %v195_v31 = vpop.f32.mrf.mxu0  ;;  %776 = vmatpush3.msra.mxu1 %v599_v56 }
  0xf3   :  { %821 = vrcp.f32 %v229_v29  ;;  %v196_v33 = vadd.f32 %v195_v31, %v63_v61  ;;  %777 = vmatprep.subr.mxu1 %v890_v0  ;;  %v590_v29 = vld [vmem:[#allocation2] sm:$0xff]  ;;  %v496_v31 = vpop.permute.xlu0 %495 }
  0xf4   :  { %v814_v34 = vpop.eup %813  ;;  %823 = vpow2.f32 %v742_v30  ;;  %v1101_v35 = vpop.f32.mrf.mxu0  ;;  %vm518_vm10 = vcmp.eq.s32.totalorder %v496_v31, 1 }
  0xf5   :  { %v230_v36 = vadd.f32 1.0, %v814_v34  ;;  %v743_v37 = vmul.f32 -1.442695, %v196_v33  ;;  %v1142_v30 = vpop.permute.xlu1 %507  ;;  %v59_v34 = vrot.slane %v1084_v60, %v1010_v27 }
  0xf6   :  { %v201_v39 = vpop.f32.mrf.mxu0  ;;  %vm522_vm14 = vcmp.eq.s32.totalorder %v1142_v30, 1 }
  0xf7   :  { %825 = vrcp.f32 %v230_v36  ;;  %v202_v41 = vadd.f32 %v201_v39, %v63_v61  ;;  %v499_v36 = vpop.permute.xlu0 %498  ;;  %v158_v39 = vadd.f32 %v1087_v62, %v59_v34  ;;  %v194_v12 = vadd.f32 %v1099_v28, %v59_v34 }
  0xf8   :  { %v816_v42 = vpop.eup %815  ;;  %827 = vpow2.f32 %v743_v37  ;;  %vm519_vm11 = vcmp.eq.s32.totalorder %v499_v36, 1  ;;  %v1156_v15 = vadd.f32 %v1101_v35, %v59_v34 }
  0xf9   :  { %v231_v43 = vadd.f32 1.0, %v816_v42  ;;  %v744_v44 = vmul.f32 -1.442695, %v202_v41  ;;  %v505_v33 = vpop.permute.xlu1 %504  ;;  %v252_v42 = vmax.f32 %v158_v39, 0.0 }
  0xfa   :  { %vm521_vm13 = vcmp.eq.s32.totalorder %v505_v33, 1 }
  0xfb   :  { %829 = vrcp.f32 %v231_v43  ;;  %v502_v41 = vpop.permute.xlu0 %501  ;;  %v164_v43 = vadd.f32 %v1089_v2, %v59_v34 }
  0xfc   :  { %v818_v45 = vpop.eup %817  ;;  %831 = vpow2.f32 %v744_v44  ;;  %vm520_vm12 = vcmp.eq.s32.totalorder %v502_v41, 1 }
  0xfd   :  { %v820_v48 = vpop.eup %819  ;;  %v352_v49 = vsel %vm1025_vm2, %v818_v45, 0.0  ;;  %v1146_v37 = vpop.permute.xlu1 %510  ;;  %vm622_vm2 = vcmask 1041409  }
  0xfe   :  { %v232_v50 = vadd.f32 1.0, %v820_v48  ;;  %362 = vperm.xlu1 %807, %v352_v49   ;;  %v170_v48 = vadd.f32 %v1091_v6, %v59_v34  ;;  %v182_v6 = vadd.f32 %v1095_v14, %v59_v34  ;;  %vm523_vm15 = vcmp.eq.s32.totalorder %v1146_v37, 1 }
 0x100   :  { %v822_v52 = vpop.eup %821  ;;  %833 = vrcp.f32 %v232_v50  ;;  %v254_v60 = vmax.f32 %v170_v48, 0.0 }
 0x101   :  { %v824_v53 = vpop.eup %823  ;;  %v353_v54 = vsel %vm1039_vm4, %v822_v52, 0.0  ;;  %vm628_vm4 = vcmask 1043459  }
 0x102   :  { %v233_v59 = vadd.f32 1.0, %v824_v53  ;;  %367 = vperm.xlu0 %806, %v353_v54   ;;  %v176_v53 = vadd.f32 %v1093_v10, %v59_v34 }
 0x104   :  { %v826_v61 = vpop.eup %825  ;;  %835 = vrcp.f32 %v233_v59 }
 0x105   :  { %v828_v63 = vpop.eup %827  ;;  %v354_v1 = vsel %vm346_vm6, %v826_v61, 0.0  ;;  %vm634_vm6 = vcmask 1045509  }
 0x106   :  { %v234_v3 = vadd.f32 1.0, %v828_v63  ;;  %372 = vperm.xlu0 %806, %v354_v1  }
 0x108   :  { %v830_v40 = vpop.eup %829  ;;  %837 = vrcp.f32 %v234_v3  ;;  %v255_v3 = vmax.f32 %v176_v53, 0.0 }
 0x109   :  { %v832_v4 = vpop.eup %831  ;;  %v355_v5 = vsel %vm347_vm3, %v830_v40, 0.0  ;;  %vm625_vm3 = vcmask 1042434  }
 0x10a   :  { %v235_v46 = vadd.f32 1.0, %v832_v4  ;;  %377 = vperm.xlu1 %807, %v355_v5  }
 0x10c   :  { %839 = vrcp.f32 %v235_v46 }
 0x10d   :  { %v834_v7 = vpop.eup %833  ;;  %841 = vrcp.f32 %v408_v9 }
 0x10e   :  { %v356_v8 = vsel %vm1014_vm1, %v834_v7, 0.0  ;;  %v188_v7 = vadd.f32 %v1097_v19, %v59_v34 }
 0x10f   :  { %382 = vperm.xlu1 %807, %v356_v8  }
 0x111   :  { %v836_v11 = vpop.eup %835 }
 0x112   :  { %v357_v38 = vsel %vm1044_vm5, %v836_v11, 0.0  ;;  %vm631_vm5 = vcmask 1044484  }
 0x113   :  { %387 = vperm.xlu1 %807, %v357_v38  }
 0x115   :  { %v838_v32 = vpop.eup %837 }
 0x116   :  { %v358_v22 = vsel %vm350_vm8, %v838_v32, 0.0  ;;  %vm640_vm8 = vcmask 1047559  }
 0x117   :  { %392 = vperm.xlu0 %806, %v358_v22   ;;  %516 = vperm.xlu1 %807, %v1071_v57   ;;  %v598_v57 = vld [vmem:[#allocation2 + $0x40] sm:$0xff]  ;;  %v256_v22 = vmax.f32 %v182_v6, 0.0 }
 0x118   :  { %778 = vmatpush3.msra.mxu1 %v598_v57 }
 0x119   :  { %v840_v16 = vpop.eup %839  ;;  %779 = vmatprep.subr.mxu1 %v890_v0 }
 0x11a   :  { %v359_v17 = vsel %vm351_vm7, %v840_v16, 0.0  ;;  %v842_v21 = vpop.eup %841  ;;  %780 = vmatpush3.msra.mxu1 %v597_v20  ;;  %v257_v16 = vmax.f32 %v188_v7, 0.0  ;;  %v258_v20 = vmax.f32 %v194_v12, 0.0  ;;  %vm637_vm7 = vcmask 1046534  }
 0x11b   :  { %397 = vperm.xlu0 %806, %v359_v17   ;;  %781 = vmatprep.subr.mxu1 %v890_v0 }
 0x11c   :  { %782 = vmatpush3.msra.mxu1 %v596_v55 }
 0x11d   :  { %783 = vmatprep.subr.mxu1 %v890_v0 }
 0x11e   :  { %784 = vmatpush3.msra.mxu1 %v595_v23 }
 0x11f   :  { %513 = vperm.xlu0 %806, %v1078_v58   ;;  %785 = vmatprep.subr.mxu1 %v890_v0  ;;  %v594_v58 = vld [vmem:[#allocation2 + $0x20] sm:$0xff] }
 0x120   :  { %786 = vmatpush3.msra.mxu1 %v594_v58  ;;  %v259_v58 = vmax.f32 %v1156_v15, 0.0 }
 0x121   :  { %787 = vmatprep.subr.mxu1 %v890_v0 }
 0x122   :  { %788 = vmatpush3.msra.mxu1 %v593_v24 }
 0x123   :  { %461 = vperm.xlu0 %806, %v842_v21   ;;  %789 = vmatprep.subr.mxu1 %v890_v0 }
 0x124   :  { %790 = vmatpush3.msra.mxu1 %v592_v25 }
 0x125   :  { %791 = vmatprep.subr.mxu1 %v890_v0 }
 0x126   :  { %792 = vmatpush3.msra.mxu1 %v591_v26 }
 0x127   :  { %793 = vmatprep.subr.mxu1 %v890_v0  ;;  %v253_v0 = vmax.f32 %v164_v43, 0.0 }
 0x128   :  { %794 = vmatpush3.msra.mxu1 %v590_v29 }
 0x179   :  { %v363_v44 = vpop.permute.xlu1 %362 }
 0x17a   :  { %v400_v45 = vmul.f32 %v363_v44, %v252_v42 }
 0x17c   :  { %v526_v50 = vsel %vm518_vm10, %v400_v45, -1e+09  ;;  %v411_v27 = vrot.slane %v400_v45, 4 }
 0x17d   :  { %v368_v49 = vpop.permute.xlu0 %367  ;;  %v534_v62 = vrot.slane %v526_v50, 4 }
 0x17e   :  { %v401_v52 = vmul.f32 %v368_v49, %v253_v0  ;;  %v412_v1 = vadd.f32 %v411_v27, %v400_v45 }
 0x17f   :  { %v535_v5 = vmax.f32 %v526_v50, %v534_v62 }
 0x180   :  { %v527_v54 = vsel %vm519_vm11, %v401_v52, -1e+09  ;;  %v417_v61 = vrot.slane %v401_v52, 4  ;;  %v413_v51 = vrot.slane %v412_v1, 2 }
 0x181   :  { %v373_v59 = vpop.permute.xlu0 %372  ;;  %v540_v63 = vrot.slane %v527_v54, 4  ;;  %v536_v14 = vrot.slane %v535_v5, 2 }
 0x182   :  { %v402_v2 = vmul.f32 %v373_v59, %v254_v60  ;;  %v418_v8 = vadd.f32 %v417_v61, %v401_v52  ;;  %v414_v56 = vadd.f32 %v413_v51, %v412_v1 }
 0x183   :  { %v541_v9 = vmax.f32 %v527_v54, %v540_v63  ;;  %v537_v24 = vmax.f32 %v535_v5, %v536_v14 }
 0x184   :  { %v423_v40 = vrot.slane %v402_v2, 4  ;;  %v528_v4 = vsel %vm520_vm12, %v402_v2, -1e+09  ;;  %v419_v17 = vrot.slane %v418_v8, 2  ;;  %v415_v34 = vrot.slane %v414_v56, 1 }
 0x185   :  { %v378_v46 = vpop.permute.xlu1 %377  ;;  %v546_v11 = vrot.slane %v528_v4, 4  ;;  %v542_v19 = vrot.slane %v541_v9, 2  ;;  %v538_v45 = vrot.slane %v537_v24, 1 }
 0x186   :  { %v403_v10 = vmul.f32 %v378_v46, %v255_v3  ;;  %v424_v38 = vadd.f32 %v423_v40, %v402_v2  ;;  %v420_v26 = vadd.f32 %v419_v17, %v418_v8  ;;  %v1163_v54 = vadd.f32 %v415_v34, %v414_v56 }
 0x187   :  { %v547_v57 = vmax.f32 %v528_v4, %v546_v11  ;;  %v543_v29 = vmax.f32 %v541_v9, %v542_v19  ;;  %v1165_v40 = vmax.f32 %v537_v24, %v538_v45 }
 0x188   :  { %v429_v13 = vrot.slane %v403_v10, 4  ;;  %v529_v32 = vsel %vm521_vm13, %v403_v10, -1e+09  ;;  %v425_v28 = vrot.slane %v424_v38, 2  ;;  %v421_v50 = vrot.slane %v420_v26, 1 }
 0x189   :  { %v552_v47 = vrot.slane %v529_v32, 4  ;;  %v548_v30 = vrot.slane %v547_v57, 2  ;;  %v544_v52 = vrot.slane %v543_v29, 1 }
 0x18a   :  { %v383_v18 = vpop.permute.xlu1 %382  ;;  %v430_v55 = vadd.f32 %v429_v13, %v403_v10  ;;  %v426_v41 = vadd.f32 %v425_v28, %v424_v38  ;;  %v422_v46 = vadd.f32 %v421_v50, %v420_v26 }
 0x18b   :  { %v404_v21 = vmul.f32 %v383_v18, %v256_v22  ;;  %v553_v23 = vmax.f32 %v529_v32, %v552_v47  ;;  %v549_v62 = vmax.f32 %v547_v57, %v548_v30  ;;  %v545_v7 = vmax.f32 %v543_v29, %v544_v52 }
 0x18c   :  { %v431_v42 = vrot.slane %v430_v55, 2  ;;  %v427_v63 = vrot.slane %v426_v41, 1 }
 0x18d   :  { %v435_v35 = vrot.slane %v404_v21, 4  ;;  %v530_v25 = vsel %vm522_vm14, %v404_v21, -1e+09  ;;  %v554_v43 = vrot.slane %v553_v23, 2  ;;  %v550_v51 = vrot.slane %v549_v62, 1 }
 0x18e   :  { %v558_v31 = vrot.slane %v530_v25, 4  ;;  %v388_v33 = vpop.permute.xlu1 %387  ;;  %v432_v2 = vadd.f32 %v431_v42, %v430_v55  ;;  %v428_v13 = vadd.f32 %v427_v63, %v426_v41 }
 0x18f   :  { %v436_v36 = vadd.f32 %v435_v35, %v404_v21  ;;  %v405_v39 = vmul.f32 %v388_v33, %v257_v16  ;;  %v555_v1 = vmax.f32 %v553_v23, %v554_v43  ;;  %v551_v21 = vmax.f32 %v549_v62, %v550_v51 }
 0x190   :  { %v559_v44 = vmax.f32 %v530_v25, %v558_v31  ;;  %v433_v32 = vrot.slane %v432_v2, 1 }
 0x191   :  { %v437_v0 = vrot.slane %v436_v36, 2  ;;  %v441_v48 = vrot.slane %v405_v39, 4  ;;  %v531_v49 = vsel %vm523_vm15, %v405_v39, -1e+09  ;;  %v556_v22 = vrot.slane %v555_v1, 1 }
 0x192   :  { %v560_v27 = vrot.slane %v559_v44, 2  ;;  %v564_v60 = vrot.slane %v531_v49, 4  ;;  %v393_v53 = vpop.permute.xlu0 %392  ;;  %v517_v5 = vpop.permute.xlu1 %516  ;;  %v434_v55 = vadd.f32 %v433_v32, %v432_v2 }
 0x193   :  { %v442_v59 = vadd.f32 %v441_v48, %v405_v39  ;;  %v406_v61 = vmul.f32 %v393_v53, %v258_v20  ;;  %v438_v4 = vadd.f32 %v437_v0, %v436_v36  ;;  %vm525_vm0 = vcmp.eq.s32.totalorder %v517_v5, 1 }
 0x194   :  { %v565_v3 = vmax.f32 %v531_v49, %v564_v60  ;;  %v561_v8 = vmax.f32 %v559_v44, %v560_v27  ;;  %v557_v23 = vmax.f32 %v555_v1, %v556_v22 }
 0x195   :  { %v443_v6 = vrot.slane %v442_v59, 2  ;;  %v447_v37 = vrot.slane %v406_v61, 4  ;;  %v439_v15 = vrot.slane %v438_v4, 1 }
 0x196   :  { %v566_v9 = vrot.slane %v565_v3, 2  ;;  %v398_v10 = vpop.permute.xlu0 %397  ;;  %v562_v17 = vrot.slane %v561_v8, 1 }
 0x197   :  { %v444_v11 = vadd.f32 %v443_v6, %v442_v59  ;;  %v448_v12 = vadd.f32 %v447_v37, %v406_v61  ;;  %v407_v38 = vmul.f32 %v398_v10, %v259_v58  ;;  %v440_v35 = vadd.f32 %v439_v15, %v438_v4 }
 0x198   :  { %v567_v18 = vmax.f32 %v565_v3, %v566_v9  ;;  %v563_v31 = vmax.f32 %v561_v8, %v562_v17 }
 0x199   :  { %v449_v14 = vrot.slane %v448_v12, 2  ;;  %v453_v47 = vrot.slane %v407_v38, 4  ;;  %v533_v16 = vsel %vm525_vm0, %v407_v38, -1e+09  ;;  %v445_v19 = vrot.slane %v444_v11, 1 }
 0x19a   :  { %v576_v56 = vrot.slane %v533_v16, 4  ;;  %v514_v57 = vpop.permute.xlu0 %513  ;;  %v568_v34 = vrot.slane %v567_v18, 1 }
 0x19b   :  { %v450_v20 = vadd.f32 %v449_v14, %v448_v12  ;;  %v454_v28 = vadd.f32 %v453_v47, %v407_v38  ;;  %vm524_vm1 = vcmp.eq.s32.totalorder %v514_v57, 1  ;;  %v446_v33 = vadd.f32 %v445_v19, %v444_v11 }
 0x19c   :  { %v577_v58 = vmax.f32 %v533_v16, %v576_v56  ;;  %v532_v24 = vsel %vm524_vm1, %v406_v61, -1e+09  ;;  %v569_v61 = vmax.f32 %v567_v18, %v568_v34 }
 0x19d   :  { %v451_v25 = vrot.slane %v450_v20, 1  ;;  %v455_v26 = vrot.slane %v454_v28, 2  ;;  %v570_v29 = vrot.slane %v532_v24, 4 }
 0x19e   :  { %v578_v30 = vrot.slane %v577_v58, 2  ;;  %v462_v36 = vpop.permute.xlu0 %461 }
 0x19f   :  { %v452_v39 = vadd.f32 %v451_v25, %v450_v20  ;;  %v456_v41 = vadd.f32 %v455_v26, %v454_v28  ;;  %v571_v42 = vmax.f32 %v532_v24, %v570_v29  ;;  %v463_v43 = vrot.slane %v462_v36, 1  ;;  %v745_v28 = vld [vmem:[%s1182_s5] ss:$0 sm:$0xff] }
 0x1a0   :  { %v579_v44 = vmax.f32 %v577_v58, %v578_v30  ;;  %v464_v45 = vrot.slane %v462_v36, 2  ;;  %v465_v0 = vrot.slane %v462_v36, 3  ;;  %v466_v48 = vrot.slane %v462_v36, 4 }
 0x1a1   :  { %v457_v49 = vrot.slane %v456_v41, 1  ;;  %v572_v50 = vrot.slane %v571_v42, 2  ;;  %v478_v52 = vmul.f32 %v462_v36, %v1163_v54  ;;  %v479_v27 = vmul.f32 %v463_v43, %v422_v46 }
 0x1a2   :  { %v580_v60 = vrot.slane %v579_v44, 1  ;;  %v480_v53 = vmul.f32 %v464_v45, %v428_v13  ;;  %v481_v62 = vmul.f32 %v465_v0, %v434_v55  ;;  %v467_v59 = vrot.slane %v462_v36, 5 }
 0x1a3   :  { %v458_v63 = vadd.f32 %v457_v49, %v456_v41  ;;  %v573_v2 = vmax.f32 %v571_v42, %v572_v50  ;;  %v583_v1 = vadd.f32 %v545_v7, %v479_v27  ;;  %v468_v3 = vrot.slane %v462_v36, 6 }
 0x1a4   :  { %v469_v4 = vrot.slane %v462_v36, 7  ;;  %v482_v6 = vmul.f32 %v466_v48, %v440_v35  ;;  %v483_v37 = vmul.f32 %v467_v59, %v446_v33  ;;  %v581_v8 = vmax.f32 %v579_v44, %v580_v60 }
 0x1a5   :  { %v574_v5 = vrot.slane %v573_v2, 1  ;;  %v584_v9 = vadd.f32 %v551_v21, %v480_v53  ;;  %v585_v10 = vadd.f32 %v557_v23, %v481_v62  ;;  %v582_v51 = vadd.f32 %v1165_v40, %v478_v52 }
 0x1a6   :  { %v484_v54 = vmul.f32 %v468_v3, %v452_v39  ;;  %v485_v46 = vmul.f32 %v469_v4, %v458_v63  ;;  %v586_v11 = vadd.f32 %v563_v31, %v482_v6  ;;  %v587_v38 = vadd.f32 %v569_v61, %v483_v37 }
 0x1a7   :  { %v575_v12 = vmax.f32 %v573_v2, %v574_v5  ;;  %v621_v13 = vrot.slane %v583_v1, 7  ;;  %v624_v32 = vrot.slane %v584_v9, 6  ;;  %v627_v14 = vrot.slane %v585_v10, 5 }
 0x1a8   :  { %v589_v22 = vadd.f32 %v581_v8, %v485_v46  ;;  %v630_v16 = vrot.slane %v586_v11, 4  ;;  %v633_v40 = vrot.slane %v587_v38, 3 }
 0x1a9   :  { %v588_v7 = vadd.f32 %v575_v12, %v484_v54  ;;  %v623_v15 = vsel %vm622_vm2, %v621_v13, %v582_v51 }
 0x1aa   :  { %v626_v47 = vsel %vm625_vm3, %v624_v32, %v623_v15  ;;  %v639_v57 = vrot.slane %v589_v22, 1 }
 0x1ab   :  { %v629_v17 = vsel %vm628_vm4, %v627_v14, %v626_v47  ;;  %v636_v19 = vrot.slane %v588_v7, 2 }
 0x1ac   :  { %v632_v18 = vsel %vm631_vm5, %v630_v16, %v629_v17 }
 0x1ad   :  { %v635_v56 = vsel %vm634_vm6, %v633_v40, %v632_v18 }
 0x1ae   :  { %v638_v21 = vsel %vm637_vm7, %v636_v19, %v635_v56 }
 0x1af   :  { %v641_v20 = vsel %vm640_vm8, %v639_v57, %v638_v21 }
 0x1b0   :  { %796 = vmatmul.mubr.f32.vlgmr.msra.gmra.mxu1 %v641_v20 }
 0x270   :  { %v709_v55 = vpop.f32.mrf.mxu1 }
 0x271   :  { %v710_v23 = vadd.f32 %v745_v28, %v709_v55 }
 0x272   :  { %v797_v58 = vpop.f32.mrf.mxu1 }
 0x273   :  { %713 = vst [vmem:[#allocation5] sm:$0xff] %v710_v23 }
 0x274   :  { %874 = shalt.err (!%p871_p9)
}
 0x275   :  { %723 = dma.vmem_to_hbm [thread:$0]  %s721_s13, 128, %s1183_s6, [#allocation4]  }
 0x276   :  { %885 = dma.done.wait [#allocation4], 128  }
 0x277   :  { %886 = vsyncadd [#allocation4], 4294967168 }
 0x278   :  { %727 = vsyncpa [#allocation3], 1 }
 0x279   :  { %728 = vsyncpa [#allocation4], 1 }

</bundles_post_ra>
